<compile_context>
chip_gen: v5e
topology: v5e:2x2
jax: 0.10.0
libtpu: 0.0.40
codegen_flags: <defaults>
</compile_context>

<pallas_src>
import jax
import jax.numpy as jnp
from jax.experimental import pallas as pl
from jax.experimental.pallas import tpu as pltpu

LN_EPS = 1e-5  # nn.LayerNorm default


def prenorm_linear_kernel(x_ref, w_ref, beff_ref, o_ref):
    # x: (TM, D), w: (D, Dout_pad) with gamma pre-folded, b_eff: (1, Dout_pad) f32.
    x = x_ref[...].astype(jnp.float32)
    d = x.shape[-1]
    inv_d = 1.0 / d

    # Single-pass LayerNorm statistics (biased variance, as in torch).
    s1 = jnp.sum(x, axis=-1, keepdims=True)
    s2 = jnp.sum(x * x, axis=-1, keepdims=True)
    mean = s1 * inv_d
    var = s2 * inv_d - mean * mean              # clamp folded into LN_EPS
    y = (x - mean) * jax.lax.rsqrt(var + LN_EPS)

    # fn(norm(x)): Linear on the MXU, operands in the weight dtype, f32 acc.
    out = jnp.dot(y.astype(w_ref.dtype), w_ref[...],
                  preferred_element_type=jnp.float32)
    o_ref[...] = (out + beff_ref[...]).astype(o_ref.dtype)


def prepare_prenorm_linear_params(gamma, beta, w, b, *, weight_dtype=None):
    """One-time parameter preparation (hoisted out of the per-call path).

    Folds the LayerNorm affine into the Linear:
        (x_hat*gamma + beta) @ W + b = x_hat @ (gamma[:,None]*W) + (beta @ W + b)
    and pads the output dim to a multiple of 128 for lane-dense stores.

    Returns (w_folded_padded, b_eff_f32 (1, Dout_pad), Dout).
    For best MXU throughput pass weight_dtype=jnp.bfloat16.
    """
    gamma = gamma.reshape(-1).astype(jnp.float32)
    beta = beta.reshape(-1).astype(jnp.float32)
    b = b.reshape(-1).astype(jnp.float32)
    wf = w.astype(jnp.float32)
    _, dout = wf.shape

    w_fold = gamma[:, None] * wf                 # (D, Dout), gamma folded
    b_eff = beta @ wf + b                        # (Dout,), beta folded, f32

    dout_pad = ((dout + 127) // 128) * 128
    if dout_pad != dout:
        w_fold = jnp.pad(w_fold, ((0, 0), (0, dout_pad - dout)))
        b_eff = jnp.pad(b_eff, (0, dout_pad - dout))

    if weight_dtype is None:
        weight_dtype = w.dtype
    return w_fold.astype(weight_dtype), b_eff.reshape(1, dout_pad), dout


def prenorm_linear_apply(x, w_p, b_eff, dout, *, tm=512):
    """x: (B, N, D) -> (B, N, dout) = Linear(LayerNorm(x)), prepped params."""
    B, N, D = x.shape
    Dw, Dout_pad = w_p.shape
    assert Dw == D
    M = B * N
    x2d = x.reshape(M, D)

    # Row tile: whole M for tiny inputs; otherwise >= 2 16-aligned tiles so
    # both v7x TensorCores get work and DMA/compute overlap exists.
    if M <= 128:
        TM = M
    else:
        half = ((-(-M // 2)) + 15) // 16 * 16    # ceil(M/2) rounded up to 16
        TM = min(tm, half)
    grid_m = pl.cdiv(M, TM)

    x_itemsize = jnp.dtype(x.dtype).itemsize
    w_itemsize = jnp.dtype(w_p.dtype).itemsize

    # Deeper buffering on the streamed x only pays off with enough grid steps.
    n_xbuf = 3 if grid_m >= 3 else 2

    # VMEM sized to the actual footprint (+25% & headroom), capped at 48 MiB
    # (~75% of v7x's 64 MiB per-TC VMEM) to leave compiler scratch headroom.
    vmem_need = (n_xbuf * TM * D * x_itemsize          # x buffers
                 + 2 * TM * Dout_pad * x_itemsize      # out buffers
                 + D * Dout_pad * w_itemsize           # W (single-buffered)
                 + 2 * Dout_pad * 4)                   # b_eff
    vmem_limit = min(max(int(vmem_need * 1.25) + (2 << 20), 16 << 20), 48 << 20)

    cost = pl.CostEstimate(
        flops=2 * M * D * Dout_pad + 6 * M * D,
        transcendentals=M,                             # one rsqrt per row
        bytes_accessed=(M * D * x_itemsize
                        + D * Dout_pad * w_itemsize
                        + M * Dout_pad * x_itemsize),
    )

    out2d = pl.pallas_call(
        prenorm_linear_kernel,
        out_shape=jax.ShapeDtypeStruct((M, Dout_pad), x.dtype),
        grid_spec=pltpu.PrefetchScalarGridSpec(
            num_scalar_prefetch=0,
            grid=(grid_m,),
            in_specs=[
                # streamed token tile (multi-buffered)
                pl.BlockSpec((TM, D), lambda i: (i, 0),
                             pipeline_mode=pl.Buffered(n_xbuf)),
                # grid-invariant weight / fused bias: single-buffered,
                # VMEM-resident across the whole grid (no second W copy).
                pl.BlockSpec((D, Dout_pad), lambda i: (0, 0),
                             pipeline_mode=pl.Buffered(1)),
                pl.BlockSpec((1, Dout_pad), lambda i: (0, 0),
                             pipeline_mode=pl.Buffered(1)),
            ],
            out_specs=pl.BlockSpec((TM, Dout_pad), lambda i: (i, 0)),
        ),
        compiler_params=pltpu.CompilerParams(
            dimension_semantics=("parallel",),         # megacore split on v7x
            vmem_limit_bytes=vmem_limit,
        ),
        cost_estimate=cost,
    )(x2d, w_p, b_eff)

    if Dout_pad != dout:
        out2d = out2d[:, :dout]
    return out2d.reshape(B, N, dout)


def prenorm_linear(x, gamma, beta, w, b, *, weight_dtype=None, tm=512):
    """One-shot convenience wrapper. For repeated calls, prefer running
    prepare_prenorm_linear_params() once and reusing its outputs."""
    w_p, b_eff, dout = prepare_prenorm_linear_params(
        gamma, beta, w, b, weight_dtype=weight_dtype)
    return prenorm_linear_apply(x, w_p, b_eff, dout, tm=tm)


def prenorm_linear_ref(x, gamma, beta, w, b):
    xf = x.astype(jnp.float32)
    mean = jnp.mean(xf, axis=-1, keepdims=True)
    var = jnp.mean((xf - mean) ** 2, axis=-1, keepdims=True)
    y = (xf - mean) * jax.lax.rsqrt(var + LN_EPS) * gamma.reshape(-1) + beta.reshape(-1)
    return (y @ w.astype(jnp.float32) + b.reshape(-1)).astype(x.dtype)


if __name__ == "__main__":
    B, N, D = 2, 8, 32  # batch, tokens, dim (small demo shapes)
    key = jax.random.PRNGKey(0)
    kx, kg, kbt, kw, kb = jax.random.split(key, 5)

    x = jax.random.normal(kx, (B, N, D), dtype=jnp.float32)

    # Non-trivial LayerNorm affine so the gamma/beta folding is actually tested.
    gamma = 1.0 + 0.1 * jax.random.normal(kg, (D,), dtype=jnp.float32)
    beta = 0.05 * jax.random.normal(kbt, (D,), dtype=jnp.float32)

    # fn = Linear(D, D)
    w = (jax.random.normal(kw, (D, D), dtype=jnp.float32) / jnp.sqrt(D))
    b = 0.01 * jax.random.normal(kb, (D,), dtype=jnp.float32)

    ref = prenorm_linear_ref(x, gamma, beta, w, b)

    # f32 weight path: one-time prep, then apply.
    w_p, b_eff, dout = prepare_prenorm_linear_params(gamma, beta, w, b)
    out = jax.block_until_ready(prenorm_linear_apply(x, w_p, b_eff, dout))
    assert out.shape == (B, N, D)
    assert jnp.allclose(out, ref, atol=2e-4, rtol=2e-4), "f32 mismatch vs reference"

    # bf16 weight path (fast MXU path on all generations), looser tolerance.
    w_p16, b_eff16, _ = prepare_prenorm_linear_params(
        gamma, beta, w, b, weight_dtype=jnp.bfloat16)
    out16 = jax.block_until_ready(prenorm_linear_apply(x, w_p16, b_eff16, dout))
    assert jnp.allclose(out16.astype(jnp.float32), ref, atol=1e-1, rtol=5e-2), \
        "bf16 mismatch vs reference"

    print("KERNEL_OK")
</pallas_src>

<mosaic_0001>
module attributes {stable_mosaic.version = 11 : i64} {
  func.func @prenorm_linear_kernel(%arg0: i32, %arg1: memref<16x32xf32, #tpu.memory_space<vmem>>, %arg2: memref<32x128xf32, #tpu.memory_space<vmem>>, %arg3: memref<1x128xf32, #tpu.memory_space<vmem>>, %arg4: memref<16x128xf32, #tpu.memory_space<vmem>>) attributes {dimension_semantics = [#tpu.dimension_semantics<parallel>], iteration_bounds = array<i64: 1>, scalar_prefetch = 0 : i64, scratch_operands = 0 : i64, tpu.core_type = #tpu.core_type<tc>, window_params = [{pipeline_mode = #tpu.pipeline_mode<double_buffered>, transform_indices = @transform_0, window_bounds = array<i64: 16, 32>}, {pipeline_mode = #tpu.pipeline_mode<synchronous>, transform_indices = @transform_1, window_bounds = array<i64: 32, 128>}, {pipeline_mode = #tpu.pipeline_mode<synchronous>, transform_indices = @transform_2, window_bounds = array<i64: 1, 128>}, {transform_indices = @transform_3, window_bounds = array<i64: 16, 128>}]} {
    %c0 = arith.constant 0 : index
    %c0_0 = arith.constant 0 : index
    %0 = vector.load %arg1[%c0, %c0_0] : memref<16x32xf32, #tpu.memory_space<vmem>>, vector<16x32xf32>
    %cst = arith.constant dense<0.000000e+00> : vector<16xf32>
    %1 = vector.multi_reduction <add>, %0, %cst [1] : vector<16x32xf32> to vector<16xf32>
    %2 = vector.shape_cast %1 : vector<16xf32> to vector<16x1xf32>
    %3 = arith.mulf %0, %0 : vector<16x32xf32>
    %cst_1 = arith.constant dense<0.000000e+00> : vector<16xf32>
    %4 = vector.multi_reduction <add>, %3, %cst_1 [1] : vector<16x32xf32> to vector<16xf32>
    %5 = vector.shape_cast %4 : vector<16xf32> to vector<16x1xf32>
    %cst_2 = arith.constant 3.125000e-02 : f32
    %6 = vector.broadcast %cst_2 : f32 to vector<16x1xf32>
    %7 = arith.mulf %2, %6 : vector<16x1xf32>
    %cst_3 = arith.constant 3.125000e-02 : f32
    %8 = vector.broadcast %cst_3 : f32 to vector<16x1xf32>
    %9 = arith.mulf %5, %8 : vector<16x1xf32>
    %10 = arith.mulf %7, %7 : vector<16x1xf32>
    %11 = arith.subf %9, %10 : vector<16x1xf32>
    %12 = vector.broadcast %7 : vector<16x1xf32> to vector<16x32xf32>
    %13 = arith.subf %0, %12 : vector<16x32xf32>
    %cst_4 = arith.constant 9.99999974E-6 : f32
    %14 = vector.broadcast %cst_4 : f32 to vector<16x1xf32>
    %15 = arith.addf %11, %14 : vector<16x1xf32>
    %16 = math.rsqrt %15 : vector<16x1xf32>
    %17 = vector.broadcast %16 : vector<16x1xf32> to vector<16x32xf32>
    %18 = arith.mulf %13, %17 : vector<16x32xf32>
    %c0_5 = arith.constant 0 : index
    %c0_6 = arith.constant 0 : index
    %19 = vector.load %arg2[%c0_5, %c0_6] : memref<32x128xf32, #tpu.memory_space<vmem>>, vector<32x128xf32>
    %cst_7 = arith.constant dense<0.000000e+00> : vector<16x128xf32>
    %20 = tpu.matmul %18, %19, %cst_7 {dimension_numbers = #tpu.dot_dimension_numbers<[1], [0], [0], [1], [0, 0, 1, 1], [], []>} : vector<16x32xf32>, vector<32x128xf32>, vector<16x128xf32> -> vector<16x128xf32>
    %c0_8 = arith.constant 0 : index
    %c0_9 = arith.constant 0 : index
    %21 = vector.load %arg3[%c0_8, %c0_9] : memref<1x128xf32, #tpu.memory_space<vmem>>, vector<1x128xf32>
    %22 = vector.broadcast %21 : vector<1x128xf32> to vector<16x128xf32>
    %23 = arith.addf %20, %22 : vector<16x128xf32>
    %c0_10 = arith.constant 0 : index
    %c0_11 = arith.constant 0 : index
    %24 = vector.load %arg4[%c0_10, %c0_11] : memref<16x128xf32, #tpu.memory_space<vmem>>, vector<16x128xf32>
    tpu.vector_store %arg4[%c0_10, %c0_11], %23 {strides = array<i32>} : memref<16x128xf32, #tpu.memory_space<vmem>>, vector<16x128xf32>,
    return
  }
  func.func @transform_0(%arg0: i32) -> (i32, i32) {
    %c0_i32 = arith.constant 0 : i32
    %c0_i32_0 = arith.constant 0 : i32
    return %arg0, %c0_i32 : i32, i32
  }
  func.func @transform_1(%arg0: i32) -> (i32, i32) {
    %c0_i32 = arith.constant 0 : i32
    %c0_i32_0 = arith.constant 0 : i32
    %c0_i32_1 = arith.constant 0 : i32
    return %c0_i32, %c0_i32_0 : i32, i32
  }
  func.func @transform_2(%arg0: i32) -> (i32, i32) {
    %c0_i32 = arith.constant 0 : i32
    %c0_i32_0 = arith.constant 0 : i32
    %c0_i32_1 = arith.constant 0 : i32
    return %c0_i32, %c0_i32_0 : i32, i32
  }
  func.func @transform_3(%arg0: i32) -> (i32, i32) {
    %c0_i32 = arith.constant 0 : i32
    %c0_i32_0 = arith.constant 0 : i32
    return %arg0, %c0_i32 : i32, i32
  }
}

</mosaic_0001>

<bundles_post_ra>
// kernel: tpu_custom_call.1
= control target key start
LH: loop header
LB: loop body
LE: loop exit
PB: predicated region body
PF: predicated region fallthrough
CT: control target
= control target key end

     0   :  { %8 = vsyncpa [#allocation3], 0  ;;  %s303_s0 = inlined_call_operand.hbm [shape: f32[16,32], index: 0, kind: input, shape index: {}]   ;;  %s304_s1 = inlined_call_operand.hbm [shape: f32[32,128], index: 1, kind: input, shape index: {}]   ;;  %s305_s2 = inlined_call_operand.vmem [shape: f32[1,128], index: 2, kind: input, shape index: {}]   ;;  %s306_s3 = inlined_call_operand.hbm [shape: f32[16,128], index: 3, kind: output, shape index: {}]  }
   0x1   :  { %9 = vsyncpa [#allocation6], 0 }
   0x2   :  { %10 = vsyncpa [#allocation4], 0  ;;  %s15_s14 = sshll.u32 %s303_s0, 4  ;;  %s251_s15 = smov [#allocation2]   ;;  %s16_s14 = int_to_ptr.hbm [resolvable:$true] %s15_s14 }
   0x3   :  { %s17_s16 = sshll.u32 %s251_s15, 4  ;;  %s28_s19 = sshll.u32 %s304_s1, 4  ;;  %s18_s16 = int_to_ptr.vmem [resolvable:$true] %s17_s16  ;;  %s29_s19 = int_to_ptr.hbm [resolvable:$true] %s28_s19 }
   0x4   :  { %s252_s20 = smov 128   ;;  %s253_s21 = smov 8  }
   0x5   :  { %23 = dma.hbm_to_vmem [thread:$0]  %s16_s14, 256, %s18_s16, [#allocation3], %s252_s20, %s252_s20, %s253_s21  }
   0x6   :  { %s254_s22 = smov [#allocation5]  }
   0x7   :  { %s30_s23 = sshll.u32 %s254_s22, 4  ;;  %s31_s23 = int_to_ptr.vmem [resolvable:$true] %s30_s23 }
   0x8   :  { %36 = dma.hbm_to_vmem [thread:$0]  %s29_s19, 512, %s31_s23, [#allocation6], %s252_s20, %s252_s20, %s253_s21  }
   0x9   :  { %245 = dma.done.wait [#allocation3], 256  }
   0xa   :  { %246 = vsyncadd [#allocation3], 4294967040 }
   0xb   :  { %247 = dma.done.wait [#allocation6], 512  }
   0xc   :  { %248 = vsyncadd [#allocation6], 4294966784  ;;  %vm49_vm0 = vcmask 261120   ;;  %v47_v0 = vld [vmem:[#allocation2] sm:$0xff]  ;;  %v48_v3 = vld [vmem:[#allocation2 + $0x8] sm:$0xff]  ;;  %s255_s24 = smov [#allocation7]  }
   0xd   :  { %v50_v1 = vsel %vm49_vm0, %v47_v0, 0.0  ;;  %v56_v2 = vmul.f32 %v47_v0, %v47_v0  ;;  %v57_v5 = vmul.f32 %v48_v3, %v48_v3  ;;  %v53_v6 = vsel %vm49_vm0, %v48_v3, 0.0  ;;  %v101_v8 = vld [vmem:[#allocation5 + $0x18] sm:$0xff]  ;;  %v100_v9 = vld [vmem:[#allocation5 + $0x10] sm:$0xff]  ;;  %v99_v10 = vld [vmem:[#allocation5 + $0x8] sm:$0xff]  ;;  %s141_s25 = sshll.u32 %s255_s24, 4  ;;  %s142_s25 = int_to_ptr.vmem [resolvable:$true] %s141_s25 }
   0xe   :  { %51 = vadd.xlane.f32.xlu0 %v50_v1  ;;  %124 = vmatpush.msra.mxu0 %v101_v8  ;;  %v98_v11 = vld [vmem:[#allocation5] sm:$0xff]  ;;  %v168_v44 = vld [vmem:[%s305_s2] ss:$0 sm:$0xff]  ;;  %s143_s28 = sshll.u32 %s306_s3, 4  ;;  %s144_s28 = int_to_ptr.hbm [resolvable:$true] %s143_s28 }
   0xf   :  { %v58_v4 = vsel %vm49_vm0, %v56_v2, 0.0  ;;  %v61_v7 = vsel %vm49_vm0, %v57_v5, 0.0  ;;  %159 = vmatpush.msra.mxu1 %v101_v8 }
  0x10   :  { %59 = vadd.xlane.f32.xlu1 %v58_v4  ;;  %125 = vmatpush.msra.mxu0 %v100_v9 }
  0x11   :  { %160 = vmatpush.msra.mxu1 %v100_v9 }
  0x12   :  { %126 = vmatpush.msra.mxu0 %v99_v10 }
  0x13   :  { %161 = vmatpush.msra.mxu1 %v99_v10 }
  0x14   :  { %127 = vmatpush.msra.mxu0 %v98_v11 }
  0x15   :  { %162 = vmatpush.msra.mxu1 %v98_v11 }
  0x16   :  { %54 = vadd.xlane.f32.xlu0 %v53_v6 }
  0x18   :  { %62 = vadd.xlane.f32.xlu1 %v61_v7 }
  0x81   :  { %v52_v12 = vpop.xlane.xlu0 %51 }
  0x82   :  { %v64_v13 = vmul.f32 0.03125, %v52_v12 }
  0x83   :  { %v60_v14 = vpop.xlane.xlu1 %59 }
  0x84   :  { %v68_v15 = vmul.f32 %v64_v13, %v64_v13  ;;  %v66_v16 = vmul.f32 0.03125, %v60_v14  ;;  %v72_v34 = vsub.f32 %v47_v0, %v64_v13 }
  0x86   :  { %v70_v17 = vsub.f32 %v66_v16, %v68_v15 }
  0x88   :  { %v74_v18 = vadd.f32 1e-05, %v70_v17 }
  0x89   :  { %v55_v19 = vpop.xlane.xlu0 %54 }
  0x8a   :  { %169 = vrsqrt.f32 %v74_v18  ;;  %v65_v20 = vmul.f32 0.03125, %v55_v19  ;;  %vm82_vm2 = vweird.f32 %v74_v18 }
  0x8b   :  { %v63_v21 = vpop.xlane.xlu1 %62 }
  0x8c   :  { %v69_v22 = vmul.f32 %v65_v20, %v65_v20  ;;  %v67_v23 = vmul.f32 0.03125, %v63_v21  ;;  %v73_v41 = vsub.f32 %v48_v3, %v65_v20 }
  0x8e   :  { %v71_v24 = vsub.f32 %v67_v23, %v69_v22 }
  0x90   :  { %v170_v25 = vpop.eup %169  ;;  %v75_v26 = vadd.f32 1e-05, %v71_v24 }
  0x91   :  { %v77_v27 = vmul.f32 %v170_v25, %v74_v18  ;;  %vm83_vm1 = vweird.f32 %v170_v25 }
  0x92   :  { %171 = vrsqrt.f32 %v75_v26  ;;  %vm84_vm3 = vmor %vm82_vm2, %vm83_vm1  ;;  %vm92_vm5 = vweird.f32 %v75_v26 }
  0x93   :  { %v78_v28 = vmul.f32 %v170_v25, %v77_v27 }
  0x95   :  { %v79_v29 = vmul.f32 0.5, %v78_v28 }
  0x97   :  { %v80_v30 = vsub.f32 1.5, %v79_v29 }
  0x98   :  { %v172_v31 = vpop.eup %171 }
  0x99   :  { %v87_v32 = vmul.f32 %v172_v31, %v75_v26  ;;  %v81_v33 = vmul.f32 %v170_v25, %v80_v30  ;;  %vm93_vm4 = vweird.f32 %v172_v31 }
  0x9a   :  { %vm94_vm6 = vmor %vm92_vm5, %vm93_vm4 }
  0x9b   :  { %v88_v35 = vmul.f32 %v172_v31, %v87_v32  ;;  %v85_v36 = vsel %vm84_vm3, %v170_v25, %v81_v33 }
  0x9c   :  { %v96_v37 = vmul.f32 %v85_v36, %v72_v34 }
  0x9d   :  { %v89_v38 = vmul.f32 0.5, %v88_v35 }
  0x9e   :  { %157 = vmatmul.msk.f32.vlgmr.msra.gmra.mxu0 %vm49_vm0, %v96_v37 }
  0x9f   :  { %v90_v39 = vsub.f32 1.5, %v89_v38 }
  0xa1   :  { %v91_v40 = vmul.f32 %v172_v31, %v90_v39 }
  0xa3   :  { %v95_v42 = vsel %vm94_vm6, %v172_v31, %v91_v40 }
  0xa4   :  { %v97_v43 = vmul.f32 %v95_v42, %v73_v41 }
  0xa6   :  { %158 = vmatmul.msk.f32.vlgmr.msra.gmra.mxu1 %vm49_vm0, %v97_v43 }
 0x11b   :  { %v129_v45 = vpop.f32.mrf.mxu0 }
 0x11c   :  { %v130_v46 = vadd.f32 %v168_v44, %v129_v45 }
 0x11e   :  { %135 = vst [vmem:[#allocation7] sm:$0xff] %v130_v46 }
 0x123   :  { %v132_v47 = vpop.f32.mrf.mxu1 }
 0x124   :  { %v133_v48 = vadd.f32 %v168_v44, %v132_v47 }
 0x126   :  { %136 = vst [vmem:[#allocation7 + $0x8] sm:$0xff] %v133_v48 }
 0x127   :  { %149 = dma.vmem_to_hbm [thread:$0]  %s142_s25, 256, %s144_s28, [#allocation4], %s252_s20, %s252_s20, %s253_s21  }
 0x128   :  { %249 = dma.done.wait [#allocation4], 256  }
 0x129   :  { %250 = vsyncadd [#allocation4], 4294967040 }
 0x12a   :  { %154 = vsyncpa [#allocation3], 1 }
 0x12b   :  { %155 = vsyncpa [#allocation6], 1 }
 0x12c   :  { %156 = vsyncpa [#allocation4], 1 }

</bundles_post_ra>
